<compile_context>
chip_gen: v6e
topology: v6e:2x2x1
jax: 0.10.0
libtpu: 0.0.40
codegen_flags: <defaults>
</compile_context>

<pallas_src>
import functools

import jax
import jax.numpy as jnp
import numpy as np
from jax.experimental import pallas as pl
from jax.experimental.pallas import tpu as pltpu

IN_DIM = 15
BN_EPS = 1e-5
LANE = 128


def _cdiv(a, b):
    return -(-a // b)


def _round_up(n, m):
    return _cdiv(n, m) * m


# --------------------------------------------------------------------------
# Kernel
# --------------------------------------------------------------------------
def make_mlp_kernel(num_hidden):
    """Kernel over one (tb, F) row block of x.

    Ref order: x, [W', b'] * num_hidden, W_out, b_out, o
      x   : (tb, F)    -- natural row-major layout of the input
      W'  : (out, in)  -- BatchNorm folded in
      b'  : (out, 1)
      o   : (1, tb)    -- batch on the lane axis (lane-dense output tile)
    """
    # rhs-transposed matmul: (out, in) x (tb, in) -> (out, tb)
    rhs_t_dims = (((1,), (1,)), ((), ()))

    def kernel(*refs):
        x_ref = refs[0]
        o_ref = refs[-1]
        params = refs[1:-1]

        h = x_ref[...]                       # (tb, F), row-major
        idx = 0
        first = True
        for _ in range(num_hidden):
            w, b = params[idx][...], params[idx + 1][...]
            idx += 2
            if first:
                # First layer contracts the feature axis of the row-major x
                # tile; from here on the batch stays on the lane axis.
                h = jax.lax.dot_general(w, h, rhs_t_dims,
                                        preferred_element_type=jnp.float32)
                first = False
            else:
                h = jnp.dot(w, h, preferred_element_type=jnp.float32)
            h = jnp.maximum(h + b, 0.0)      # folded-BN bias + ReLU (VPU)
            # Dropout: identity in inference mode.
        w_out, b_out = params[idx][...], params[idx + 1][...]
        if first:
            out = jax.lax.dot_general(w_out, h, rhs_t_dims,
                                      preferred_element_type=jnp.float32)
        else:
            out = jnp.dot(w_out, h, preferred_element_type=jnp.float32)
        o_ref[...] = (out + b_out).astype(o_ref.dtype)   # (1, tb), lane-dense

    return kernel


# --------------------------------------------------------------------------
# BN folding (one-time, outside the jitted per-call path)
# --------------------------------------------------------------------------
def fold_bn_params(params):
    """params: [W(out,in), b(out,), g, beta, mean, var]*L + [W_out(1,in), b_out(1,)].

    Returns [W'(out,in), b'(out,1)]*L + [W_out(1,in), b_out(1,1)].
    """
    num_hidden = (len(params) - 2) // 6
    folded = []
    idx = 0
    for _ in range(num_hidden):
        w, b, g, beta, mean, var = params[idx:idx + 6]
        idx += 6
        scale = g * jax.lax.rsqrt(var + BN_EPS)                  # (out,)
        w_f = w * scale[:, None]                                 # (out, in)
        b_f = (b - mean) * scale + beta                          # (out,)
        folded += [w_f.astype(jnp.float32), b_f.reshape(-1, 1).astype(jnp.float32)]
    w_out, b_out = params[idx], params[idx + 1]
    folded += [w_out.astype(jnp.float32), b_out.reshape(-1, 1).astype(jnp.float32)]
    return folded


# --------------------------------------------------------------------------
# Tile selection
# --------------------------------------------------------------------------
def _choose_tiles(B, batch_tile):
    """Pick (tb, n_tiles): lane-aligned, big (overhead-amortizing), balanced."""
    batch_tile = max(LANE, _round_up(batch_tile, LANE))
    if B <= LANE:
        return B, 1                      # single full-array block, no waste
    b_lane = _round_up(B, LANE)
    # >= 2 grid steps (v7x has 2 TensorCores), preferably even, balanced work.
    n = max(2, _cdiv(b_lane, batch_tile))
    if n % 2:
        n += 1
    tb = _round_up(_cdiv(b_lane, n), LANE)
    n_tiles = _cdiv(B, tb)
    return tb, n_tiles


# --------------------------------------------------------------------------
# Jitted forward (takes already-folded params)
# --------------------------------------------------------------------------
@functools.partial(jax.jit, static_argnames=("batch_tile",))
def polytope_forward_folded(x, folded, *, batch_tile=8192):
    """x: (B, 15) float32.  folded: output of fold_bn_params()."""
    B, F = x.shape
    assert F == IN_DIM
    num_hidden = (len(folded) - 2) // 2
    kernel = make_mlp_kernel(num_hidden)
    tb, n_tiles = _choose_tiles(B, batch_tile)

    # Contiguous row blocks of x; params are small and stay resident in VMEM.
    in_specs = [pl.BlockSpec((tb, F), lambda i: (i, 0))]
    for p in folded:
        in_specs.append(pl.BlockSpec(p.shape, lambda i: (0, 0)))
    out_spec = pl.BlockSpec((1, tb), lambda i: (0, i))            # lane-dense

    # Advisory cost estimate so XLA can schedule around this short call.
    dims = [F] + [folded[2 * l].shape[0] for l in range(num_hidden)] + [1]
    flops = 2 * B * sum(a * b for a, b in zip(dims[:-1], dims[1:]))
    param_bytes = sum(int(np.prod(p.shape)) * p.dtype.itemsize for p in folded)
    cost = pl.CostEstimate(
        flops=flops,
        transcendentals=0,
        bytes_accessed=B * F * x.dtype.itemsize + 4 * B + param_bytes,
    )

    out = pl.pallas_call(
        kernel,
        out_shape=jax.ShapeDtypeStruct((1, B), jnp.float32),
        grid=(n_tiles,),
        in_specs=in_specs,
        out_specs=out_spec,
        compiler_params=pltpu.CompilerParams(dimension_semantics=("parallel",)),
        cost_estimate=cost,
    )(x, *folded)
    return out[0]                                                # .squeeze(1)


def polytope_forward(x, params, *, batch_tile=8192):
    """Convenience wrapper: fold BN then run the jitted forward.

    Prefer folding once with fold_bn_params() and calling
    polytope_forward_folded() repeatedly.
    """
    return polytope_forward_folded(x, fold_bn_params(params), batch_tile=batch_tile)


# --------------------------------------------------------------------------
# Deterministic parameter init (mirrors nn.Module shapes; torch layout)
# --------------------------------------------------------------------------
def init_params(key, layers):
    """Flat list: [W(out,in), b(out,), gamma, beta, mean, var]*L + [W_out(1,in), b_out(1,)]."""
    params = []
    in_dim = IN_DIM
    for neurons in layers:
        key, k_w, k_b, k_g, k_be, k_m, k_v = jax.random.split(key, 7)
        bound = 1.0 / np.sqrt(in_dim)
        w = jax.random.uniform(k_w, (neurons, in_dim), jnp.float32, -bound, bound)
        b = jax.random.uniform(k_b, (neurons,), jnp.float32, -bound, bound)
        gamma = 1.0 + 0.1 * jax.random.normal(k_g, (neurons,), jnp.float32)
        beta = 0.1 * jax.random.normal(k_be, (neurons,), jnp.float32)
        mean = 0.1 * jax.random.normal(k_m, (neurons,), jnp.float32)
        var = jax.random.uniform(k_v, (neurons,), jnp.float32, 0.5, 1.5)
        params += [w, b, gamma, beta, mean, var]
        in_dim = neurons
    key, k_w, k_b = jax.random.split(key, 3)
    bound = 1.0 / np.sqrt(in_dim)
    w_out = jax.random.uniform(k_w, (1, in_dim), jnp.float32, -bound, bound)
    b_out = jax.random.uniform(k_b, (1,), jnp.float32, -bound, bound)
    params += [w_out, b_out]
    return params


# --------------------------------------------------------------------------
# Pure-JAX reference (un-folded BN, for a silent correctness check)
# --------------------------------------------------------------------------
def reference_forward(x, params):
    num_hidden = (len(params) - 2) // 6
    h = x.astype(jnp.float32)
    idx = 0
    for _ in range(num_hidden):
        w, b, g, beta, mean, var = params[idx:idx + 6]
        idx += 6
        h = h @ w.T + b
        h = (h - mean) / jnp.sqrt(var + BN_EPS) * g + beta
        h = jnp.maximum(h, 0.0)
    w_out, b_out = params[idx], params[idx + 1]
    return (h @ w_out.T + b_out)[:, 0]


# --------------------------------------------------------------------------
if __name__ == "__main__":
    key = jax.random.PRNGKey(0)
    k_x, k_p, k_x2 = jax.random.split(key, 3)

    layers = [32, 16]          # hidden layer widths (as passed to PolytopeModel)
    # dropout = [0.2, 0.1]     # inference mode -> identity

    params = init_params(k_p, layers)
    folded = fold_bn_params(params)      # fold once, reuse across calls

    # Small-batch path (single full-array block).
    batch = 16
    x = jax.random.normal(k_x, (batch, IN_DIM), jnp.float32)
    y = jax.block_until_ready(polytope_forward_folded(x, folded))
    np.testing.assert_allclose(np.asarray(y),
                               np.asarray(reference_forward(x, params)),
                               rtol=1e-4, atol=1e-4)
    assert y.shape == (batch,)

    # Multi-tile path: balanced 2-step grid + ragged last block (B=300).
    batch2 = 300
    x2 = jax.random.normal(k_x2, (batch2, IN_DIM), jnp.float32)
    y2 = jax.block_until_ready(polytope_forward_folded(x2, folded))
    np.testing.assert_allclose(np.asarray(y2),
                               np.asarray(reference_forward(x2, params)),
                               rtol=1e-4, atol=1e-4)
    assert y2.shape == (batch2,)

    print("KERNEL_OK")
</pallas_src>

<mosaic_0001>
module attributes {stable_mosaic.version = 11 : i64} {
  func.func @kernel(%arg0: i32, %arg1: memref<16x15xf32, #tpu.memory_space<vmem>>, %arg2: memref<32x15xf32, #tpu.memory_space<vmem>>, %arg3: memref<32x1xf32, #tpu.memory_space<vmem>>, %arg4: memref<16x32xf32, #tpu.memory_space<vmem>>, %arg5: memref<16x1xf32, #tpu.memory_space<vmem>>, %arg6: memref<1x16xf32, #tpu.memory_space<vmem>>, %arg7: memref<1x1xf32, #tpu.memory_space<vmem>>, %arg8: memref<1x16xf32, #tpu.memory_space<vmem>>) attributes {dimension_semantics = [#tpu.dimension_semantics<parallel>], iteration_bounds = array<i64: 1>, scalar_prefetch = 0 : i64, scratch_operands = 0 : i64, tpu.core_type = #tpu.core_type<tc>, window_params = [{transform_indices = @transform_0, window_bounds = array<i64: 16, 15>}, {pipeline_mode = #tpu.pipeline_mode<synchronous>, transform_indices = @transform_1, window_bounds = array<i64: 32, 15>}, {pipeline_mode = #tpu.pipeline_mode<synchronous>, transform_indices = @transform_2, window_bounds = array<i64: 32, 1>}, {pipeline_mode = #tpu.pipeline_mode<synchronous>, transform_indices = @transform_3, window_bounds = array<i64: 16, 32>}, {pipeline_mode = #tpu.pipeline_mode<synchronous>, transform_indices = @transform_4, window_bounds = array<i64: 16, 1>}, {pipeline_mode = #tpu.pipeline_mode<synchronous>, transform_indices = @transform_5, window_bounds = array<i64: 1, 16>}, {pipeline_mode = #tpu.pipeline_mode<synchronous>, transform_indices = @transform_6, window_bounds = array<i64: 1, 1>}, {transform_indices = @transform_7, window_bounds = array<i64: 1, 16>}]} {
    %c0 = arith.constant 0 : index
    %c0_0 = arith.constant 0 : index
    %0 = vector.load %arg1[%c0, %c0_0] : memref<16x15xf32, #tpu.memory_space<vmem>>, vector<16x15xf32>
    %c0_1 = arith.constant 0 : index
    %c0_2 = arith.constant 0 : index
    %1 = vector.load %arg2[%c0_1, %c0_2] : memref<32x15xf32, #tpu.memory_space<vmem>>, vector<32x15xf32>
    %c0_3 = arith.constant 0 : index
    %c0_4 = arith.constant 0 : index
    %2 = vector.load %arg3[%c0_3, %c0_4] : memref<32x1xf32, #tpu.memory_space<vmem>>, vector<32x1xf32>
    %cst = arith.constant dense<0.000000e+00> : vector<32x16xf32>
    %3 = tpu.matmul %1, %0, %cst {dimension_numbers = #tpu.dot_dimension_numbers<[1], [1], [0], [0], [0, 0, 1, 0], [], []>} : vector<32x15xf32>, vector<16x15xf32>, vector<32x16xf32> -> vector<32x16xf32>
    %4 = vector.broadcast %2 : vector<32x1xf32> to vector<32x16xf32>
    %5 = arith.addf %3, %4 : vector<32x16xf32>
    %cst_5 = arith.constant 0.000000e+00 : f32
    %6 = vector.broadcast %cst_5 : f32 to vector<32x16xf32>
    %7 = arith.maximumf %5, %6 : vector<32x16xf32>
    %c0_6 = arith.constant 0 : index
    %c0_7 = arith.constant 0 : index
    %8 = vector.load %arg4[%c0_6, %c0_7] : memref<16x32xf32, #tpu.memory_space<vmem>>, vector<16x32xf32>
    %c0_8 = arith.constant 0 : index
    %c0_9 = arith.constant 0 : index
    %9 = vector.load %arg5[%c0_8, %c0_9] : memref<16x1xf32, #tpu.memory_space<vmem>>, vector<16x1xf32>
    %cst_10 = arith.constant dense<0.000000e+00> : vector<16x16xf32>
    %10 = tpu.matmul %8, %7, %cst_10 {dimension_numbers = #tpu.dot_dimension_numbers<[1], [0], [0], [1], [0, 0, 1, 1], [], []>} : vector<16x32xf32>, vector<32x16xf32>, vector<16x16xf32> -> vector<16x16xf32>
    %11 = vector.broadcast %9 : vector<16x1xf32> to vector<16x16xf32>
    %12 = arith.addf %10, %11 : vector<16x16xf32>
    %cst_11 = arith.constant 0.000000e+00 : f32
    %13 = vector.broadcast %cst_11 : f32 to vector<16x16xf32>
    %14 = arith.maximumf %12, %13 : vector<16x16xf32>
    %c0_12 = arith.constant 0 : index
    %c0_13 = arith.constant 0 : index
    %15 = vector.load %arg6[%c0_12, %c0_13] : memref<1x16xf32, #tpu.memory_space<vmem>>, vector<1x16xf32>
    %c0_14 = arith.constant 0 : index
    %c0_15 = arith.constant 0 : index
    %16 = vector.load %arg7[%c0_14, %c0_15] : memref<1x1xf32, #tpu.memory_space<vmem>>, vector<1x1xf32>
    %cst_16 = arith.constant dense<0.000000e+00> : vector<1x16xf32>
    %17 = tpu.matmul %15, %14, %cst_16 {dimension_numbers = #tpu.dot_dimension_numbers<[1], [0], [0], [1], [0, 0, 1, 1], [], []>} : vector<1x16xf32>, vector<16x16xf32>, vector<1x16xf32> -> vector<1x16xf32>
    %18 = vector.broadcast %16 : vector<1x1xf32> to vector<1x16xf32>
    %19 = arith.addf %17, %18 : vector<1x16xf32>
    %c0_17 = arith.constant 0 : index
    %c0_18 = arith.constant 0 : index
    %20 = vector.load %arg8[%c0_17, %c0_18] : memref<1x16xf32, #tpu.memory_space<vmem>>, vector<1x16xf32>
    tpu.vector_store %arg8[%c0_17, %c0_18], %19 {strides = array<i32>} : memref<1x16xf32, #tpu.memory_space<vmem>>, vector<1x16xf32>,
    return
  }
  func.func @transform_0(%arg0: i32) -> (i32, i32) {
    %c0_i32 = arith.constant 0 : i32
    %c0_i32_0 = arith.constant 0 : i32
    return %arg0, %c0_i32 : i32, i32
  }
  func.func @transform_1(%arg0: i32) -> (i32, i32) {
    %c0_i32 = arith.constant 0 : i32
    %c0_i32_0 = arith.constant 0 : i32
    %c0_i32_1 = arith.constant 0 : i32
    return %c0_i32, %c0_i32_0 : i32, i32
  }
  func.func @transform_2(%arg0: i32) -> (i32, i32) {
    %c0_i32 = arith.constant 0 : i32
    %c0_i32_0 = arith.constant 0 : i32
    %c0_i32_1 = arith.constant 0 : i32
    return %c0_i32, %c0_i32_0 : i32, i32
  }
  func.func @transform_3(%arg0: i32) -> (i32, i32) {
    %c0_i32 = arith.constant 0 : i32
    %c0_i32_0 = arith.constant 0 : i32
    %c0_i32_1 = arith.constant 0 : i32
    return %c0_i32, %c0_i32_0 : i32, i32
  }
  func.func @transform_4(%arg0: i32) -> (i32, i32) {
    %c0_i32 = arith.constant 0 : i32
    %c0_i32_0 = arith.constant 0 : i32
    %c0_i32_1 = arith.constant 0 : i32
    return %c0_i32, %c0_i32_0 : i32, i32
  }
  func.func @transform_5(%arg0: i32) -> (i32, i32) {
    %c0_i32 = arith.constant 0 : i32
    %c0_i32_0 = arith.constant 0 : i32
    %c0_i32_1 = arith.constant 0 : i32
    return %c0_i32, %c0_i32_0 : i32, i32
  }
  func.func @transform_6(%arg0: i32) -> (i32, i32) {
    %c0_i32 = arith.constant 0 : i32
    %c0_i32_0 = arith.constant 0 : i32
    %c0_i32_1 = arith.constant 0 : i32
    return %c0_i32, %c0_i32_0 : i32, i32
  }
  func.func @transform_7(%arg0: i32) -> (i32, i32) {
    %c0_i32 = arith.constant 0 : i32
    %c0_i32_0 = arith.constant 0 : i32
    return %c0_i32, %arg0 : i32, i32
  }
}

</mosaic_0001>

<bundles_post_ra>
// kernel: polytope_forward_folded.1
= control target key start
LH: loop header
LB: loop body
LE: loop exit
PB: predicated region body
PF: predicated region fallthrough
CT: control target
= control target key end

     0   :  { %s551_s0 = inlined_call_operand.vmem [shape: f32[16,15], index: 0, kind: input, shape index: {}]   ;;  %s552_s1 = inlined_call_operand.vmem [shape: f32[32,15], index: 1, kind: input, shape index: {}]   ;;  %s553_s2 = inlined_call_operand.vmem [shape: f32[32,1], index: 2, kind: input, shape index: {}]   ;;  %s554_s3 = inlined_call_operand.vmem [shape: f32[16,32], index: 3, kind: input, shape index: {}]   ;;  %s555_s4 = inlined_call_operand.vmem [shape: f32[16,1], index: 4, kind: input, shape index: {}]   ;;  %s556_s5 = inlined_call_operand.vmem [shape: f32[1,16], index: 5, kind: input, shape index: {}]   ;;  %s557_s6 = inlined_call_operand.<no memory space> [shape: f32[1,1], index: 6, kind: input, shape index: {}]   ;;  %s558_s7 = inlined_call_operand.hbm [shape: f32[1,16], index: 7, kind: output, shape index: {}]  }
   0x1   :  { %v12_v0 = vstv %s557_s6 }
   0x2   :  { %13 = vst [vmem:[#allocation2] sm:$0x1] %v12_v0 }
   0x3   :  { %v30_v1 = vld [vmem:[%s551_s0 + $0x8] sm:$0xff]  ;;  %vm59_vm0 = vcmask 121856   ;;  %v29_v2 = vld [vmem:[%s551_s0] sm:$0xff]  ;;  %v446_v4 = vmov 0   ;;  %v38_v5 = vld [vmem:[%s553_s2 + $0x18] sm:$0xff] }
   0x4   :  { %v31_v3 = vld [vmem:[%s552_s1] sm:$0xff]  ;;  %390 = vmatprep.subr.msk.mxu0 %vm59_vm0, %v30_v1  ;;  %422 = vset.pattern.permute.xlu0 %v446_v4  ;;  %v36_v6 = vld [vmem:[%s553_s2 + $0x8] sm:$0xff]  ;;  %v37_v7 = vld [vmem:[%s553_s2 + $0x10] sm:$0xff] }
   0x5   :  { %394 = vmatprep.mubr.msk.f32.mxu0 %vm59_vm0, %v31_v3  ;;  %391 = vmatpush3.xpose.msk.msra.mxu0 %vm59_vm0, %v30_v1 }
   0x6   :  { %392 = vmatprep.subr.msk.mxu0 %vm59_vm0, %v29_v2  ;;  %56 = vperm.xlu0 %422, %v38_v5  }
   0x7   :  { %423 = vset.pattern.permute.xlu1 %v446_v4 }
   0x8   :  { %14 = vsyncpa [#allocation4], 0  ;;  %46 = vperm.xlu1 %423, %v36_v6   ;;  %v32_v8 = vld [vmem:[%s552_s1 + $0x8] sm:$0xff]  ;;  %v35_v9 = vld [vmem:[%s553_s2] sm:$0xff]  ;;  %vm181_vm1 = vcmask 261120   ;;  %v447_v33 = vmov 0.0   ;;  %v272_v43 = vlaneseq }
   0x9   :  { %393 = vmatpush3.xpose.msk.msra.mxu0 %vm59_vm0, %v29_v2  ;;  %v33_v10 = vld [vmem:[%s552_s1 + $0x10] sm:$0xff]  ;;  %v170_v11 = vld [vmem:[%s555_s4 + $0x8] sm:$0xff]  ;;  %v34_v12 = vld [vmem:[%s552_s1 + $0x18] sm:$0xff]  ;;  %vm448_vm2 = vmmov 0   ;;  %vm276_vm3 = vcmask 130048   ;;  %vm350_vm4 = vcmask 122880  }
   0xa   :  { %51 = vperm.xlu0 %422, %v37_v7   ;;  %v169_v13 = vld [vmem:[%s555_s4] sm:$0xff]  ;;  %v168_v32 = vld [vmem:[%s554_s3 + $0x8] sm:$0xff]  ;;  %v273_v44 = vshrl.u32 %v272_v43, 7 }
   0xb   :  { %v266_v14 = vld [vmem:[#allocation2] sm:$0x1] }
   0xc   :  { %395 = vmatmul.mubr.msk.f32.vlgmr.msra.gmra.mxu0 %vm59_vm0, %v32_v8  ;;  %41 = vperm.xlu1 %423, %v35_v9   ;;  %v167_v15 = vld [vmem:[%s554_s3] sm:$0xff]  ;;  %v274_v45 = vsub.s32 0, %v273_v44  ;;  %s449_s3 = smov [#allocation3]  }
   0xd   :  { %397 = vmatprep.mubr.msk.f32.mxu0 %vm59_vm0, %v33_v10  ;;  %408 = vmatprep.mubr.msk.f32.mxu1 %vm181_vm1, %v167_v15  ;;  %v265_v42 = vld [vmem:[%s556_s5] sm:$0x1]  ;;  %s358_s28 = sshll.u32 %s449_s3, 4  ;;  %s359_s28 = int_to_ptr.vmem [resolvable:$true] %s358_s28 }
   0xe   :  { %178 = vperm.xlu0 %422, %v170_v11   ;;  %s424_s29 = scalar_lea.vmem %s359_s28, 16  ;;  %s428_s5 = scalar_lea.vmem %s359_s28, 32 }
   0xf   :  { %p425_p0 = scmp.ne.s32.totalorder %s359_s28, %s424_s29  ;;  %p429_p1 = scmp.lt.s32.totalorder %s359_s28, %s359_s28 }
  0x10   :  { %398 = vmatmul.mubr.msk.f32.gmra.mxu0 %vm59_vm0, %v34_v12  ;;  %173 = vperm.xlu1 %423, %v169_v13   ;;  %p430_p2 = scmp.lt.s32.totalorder %s428_s5, %s424_s29 }
  0x12   :  { %269 = vperm.xlu0 %422, %v266_v14   ;;  %p431_p3 = por %p430_p2, %p429_p1 }
  0x14   :  { %p432_p4 = pnand %p431_p3, %p425_p0 }
  0x81   :  { %v57_v16 = vpop.permute.xlu0 %56 }
  0x83   :  { %v47_v17 = vpop.permute.xlu1 %46 }
  0x85   :  { %v52_v21 = vpop.permute.xlu0 %51 }
  0x87   :  { %v42_v23 = vpop.permute.xlu1 %41 }
  0x89   :  { %v179_v34 = vpop.permute.xlu0 %178 }
  0x8b   :  { %v174_v37 = vpop.permute.xlu1 %173 }
  0x8d   :  { %v270_v46 = vpop.permute.xlu0 %269 }
  0x8e   :  { %v275_v47 = vrot.slane %v270_v46, %v274_v45 }
  0xcc   :  { %v396_v18 = vpop.f32.mrf.mxu0 }
  0xcd   :  { %v150_v25 = vadd.f32 %v396_v18, %v47_v17 }
  0xce   :  { %v144_v19 = vpop.f32.mrf.mxu0 }
  0xcf   :  { %v145_v28 = vadd.f32 %v144_v19, %v42_v23  ;;  %v164_v30 = vmax.f32 %v150_v25, 0.0 }
  0xd0   :  { %v399_v20 = vpop.f32.mrf.mxu0 }
  0xd1   :  { %v160_v22 = vadd.f32 %v399_v20, %v57_v16  ;;  %v163_v31 = vmax.f32 %v145_v28, 0.0 }
  0xd2   :  { %v154_v24 = vpop.f32.mrf.mxu0 }
  0xd3   :  { %v166_v26 = vmax.f32 %v160_v22, 0.0  ;;  %v155_v27 = vadd.f32 %v154_v24, %v52_v21 }
  0xd5   :  { %v165_v29 = vmax.f32 %v155_v27, 0.0  ;;  %400 = vmatprep.subr.mxu1 %v166_v26 }
  0xd6   :  { %401 = vmatpush3.msra.mxu1 %v166_v26 }
  0xd7   :  { %402 = vmatprep.subr.mxu1 %v165_v29 }
  0xd8   :  { %403 = vmatpush3.msra.mxu1 %v165_v29 }
  0xd9   :  { %404 = vmatprep.subr.mxu1 %v164_v30 }
  0xda   :  { %405 = vmatpush3.msra.mxu1 %v164_v30 }
  0xdb   :  { %406 = vmatprep.subr.mxu1 %v163_v31 }
  0xdc   :  { %407 = vmatpush3.msra.mxu1 %v163_v31 }
  0xdd   :  { %409 = vmatmul.mubr.msk.f32.vlgmr.msra.gmra.mxu1 %vm181_vm1, %v168_v32  ;;  %411 = vmatprep.subr.mxu1 %v447_v33 }
  0xde   :  { %415 = vmatprep.mubr.msk.f32.mxu1 %vm448_vm2, %v447_v33 }
 0x19d   :  { %v410_v35 = vpop.f32.mrf.mxu1 }
 0x19e   :  { %v260_v36 = vadd.f32 %v410_v35, %v179_v34 }
 0x19f   :  { %v254_v38 = vpop.f32.mrf.mxu1 }
 0x1a0   :  { %v264_v39 = vmax.f32 %v260_v36, 0.0  ;;  %v255_v40 = vadd.f32 %v254_v38, %v174_v37 }
 0x1a2   :  { %v263_v41 = vmax.f32 %v255_v40, 0.0  ;;  %412 = vmatpush3.msra.mxu1 %v264_v39 }
 0x1a3   :  { %413 = vmatprep.subr.mxu1 %v447_v33 }
 0x1a4   :  { %414 = vmatpush3.msra.mxu1 %v263_v41 }
 0x1a5   :  { %416 = vmatmul.mubr.msk.f32.vlgmr.msra.gmra.mxu1 %vm276_vm3, %v265_v42 }
 0x265   :  { %v346_v48 = vpop.f32.mrf.mxu1 }
 0x266   :  { %v347_v49 = vadd.f32 %v346_v48, %v275_v47 }
 0x267   :  { %v417_v50 = vpop.f32.mrf.mxu1 }
 0x268   :  { %351 = vst.msk [vmem:[#allocation3] sm:$0x1] %vm350_vm4, %v347_v49 }
 0x269   :  { %435 = shalt.err (!%p432_p4)
}
 0x26a   :  { %361 = dma.vmem_to_hbm [thread:$0]  %s359_s28, 16, %s558_s7, [#allocation4]  }
 0x26b   :  { %444 = dma.done.wait [#allocation4], 16  }
 0x26c   :  { %445 = vsyncadd [#allocation4], 4294967280 }
 0x26d   :  { %365 = vsyncpa [#allocation4], 1 }

</bundles_post_ra>
